<compile_context>
chip_gen: v6e
topology: v6e:2x2x1
jax: 0.10.0
libtpu: 0.0.40
codegen_flags: <defaults>
</compile_context>

<pallas_src>
import functools

import jax
import jax.numpy as jnp
from jax.experimental import pallas as pl
from jax.experimental.pallas import tpu as pltpu


def _round_up(x, m):
    return ((x + m - 1) // m) * m


def _linear_bias_kernel(x_ref, w_ref, b_ref, o_ref, acc_ref):
    """Computes one (tm, tn) output tile; the K reduction runs on grid axis 2."""
    k = pl.program_id(2)

    @pl.when(k == 0)
    def _():
        acc_ref[...] = jnp.zeros_like(acc_ref)

    acc_ref[...] += jnp.dot(x_ref[...], w_ref[...],
                            preferred_element_type=jnp.float32)

    @pl.when(k == pl.num_programs(2) - 1)
    def _():
        o_ref[...] = (acc_ref[...] + b_ref[...].astype(jnp.float32)
                      ).astype(o_ref.dtype)


def _default_tiles(M, K, N):
    # Modest tiles: MXU-friendly multiples of (8, 128), capped so that the
    # double-buffered footprint stays far below v5e's 16 MiB scoped default
    # and v7x's 64 MiB physical VMEM.
    tm = min(256, _round_up(M, 8))
    tk = min(512, _round_up(K, 128))
    tn = min(256, _round_up(N, 128))
    return tm, tk, tn


@functools.partial(jax.jit,
                   static_argnames=("heads", "action_dim", "tiles", "use_bf16"))
def linear_multi_head_policy(x, weight_t, bias, heads, action_dim,
                             tiles=None, use_bf16=False):
    """Pallas equivalent of LinearMultiHeadPolicy.forward.

    x:        (B, input_dim) float32
    weight_t: (input_dim, action_dim*heads)  -- PyTorch Linear weight,
              PRE-TRANSPOSED once at init time (not per call).
    bias:     (action_dim*heads,)
    returns   (B, heads, action_dim)
    """
    B, K = x.shape
    Kw, N = weight_t.shape
    assert Kw == K and N == heads * action_dim

    tm, tk, tn = tiles if tiles is not None else _default_tiles(B, K, N)

    # Pad every dim up to a tile multiple. K-padding is zeros (contributes 0
    # to the dot); M/N padding is sliced off after the call. This also keeps
    # the output lane dimension a dense multiple of 128.
    Mp, Kp, Np = _round_up(B, tm), _round_up(K, tk), _round_up(N, tn)

    in_dtype = jnp.bfloat16 if use_bf16 else x.dtype
    x_p = jnp.pad(x, ((0, Mp - B), (0, Kp - K))).astype(in_dtype)
    w_p = jnp.pad(weight_t, ((0, Kp - K), (0, Np - N))).astype(in_dtype)
    b_p = jnp.pad(bias, (0, Np - N)).reshape(1, Np).astype(jnp.float32)

    grid = (Mp // tm, Np // tn, Kp // tk)

    in_bytes = jnp.dtype(in_dtype).itemsize
    out_bytes = jnp.dtype(x.dtype).itemsize
    # double-buffered x/W/bias/out tiles + resident f32 accumulator
    footprint = (2 * (tm * tk + tk * tn) * in_bytes
                 + 2 * tn * 4
                 + 2 * tm * tn * out_bytes
                 + tm * tn * 4)
    vmem_limit = int(min(64 * 1024 * 1024, max(2 * footprint, 8 * 1024 * 1024)))

    cost = pl.CostEstimate(
        flops=2 * Mp * Kp * Np,
        transcendentals=0,
        bytes_accessed=(Mp * Kp * in_bytes + Kp * Np * in_bytes
                        + Np * 4 + Mp * Np * out_bytes),
    )

    out = pl.pallas_call(
        _linear_bias_kernel,
        out_shape=jax.ShapeDtypeStruct((Mp, Np), x.dtype),
        grid_spec=pltpu.PrefetchScalarGridSpec(
            num_scalar_prefetch=0,
            grid=grid,
            in_specs=[
                pl.BlockSpec((tm, tk), lambda i, j, k: (i, k)),
                pl.BlockSpec((tk, tn), lambda i, j, k: (k, j)),
                pl.BlockSpec((1, tn), lambda i, j, k: (0, j)),
            ],
            out_specs=pl.BlockSpec((tm, tn), lambda i, j, k: (i, j)),
            scratch_shapes=[pltpu.VMEM((tm, tn), jnp.float32)],
        ),
        compiler_params=pltpu.CompilerParams(
            dimension_semantics=("parallel", "parallel", "arbitrary"),
            vmem_limit_bytes=vmem_limit,
        ),
        cost_estimate=cost,
    )(x_p, w_p, b_p)

    # slice off padding, then the PyTorch x.view(-1, heads, action_dim)
    return out[:B, :N].reshape(-1, heads, action_dim)


if __name__ == "__main__":
    key = jax.random.PRNGKey(0)

    # --- Test 1: small shapes consistent with the module ------------------
    B, input_dim, heads, action_dim = 8, 32, 4, 16
    d_out = heads * action_dim

    kx, kw, kb = jax.random.split(key, 3)
    bound = 1.0 / (input_dim ** 0.5)
    weight = jax.random.uniform(kw, (d_out, input_dim), jnp.float32, -bound, bound)
    bias = jax.random.uniform(kb, (d_out,), jnp.float32, -bound, bound)
    x = jax.random.normal(kx, (B, input_dim), jnp.float32)

    # Pre-transpose ONCE at parameter-setup time (moved out of the hot path).
    weight_t = jnp.asarray(weight.T)  # (input_dim, d_out)

    y = linear_multi_head_policy(x, weight_t, bias, heads, action_dim)
    y = jax.block_until_ready(y)

    y_ref = (x @ weight.T + bias).reshape(-1, heads, action_dim)
    assert y.shape == (B, heads, action_dim), y.shape
    assert jnp.allclose(y, y_ref, atol=1e-5, rtol=1e-5), "mismatch vs reference (small)"

    # --- Test 2: exercise the multi-tile grid (M/N/K all > 1 tile) --------
    B2, input_dim2, heads2, action_dim2 = 100, 300, 4, 80
    d_out2 = heads2 * action_dim2

    k2x, k2w, k2b = jax.random.split(jax.random.PRNGKey(1), 3)
    bound2 = 1.0 / (input_dim2 ** 0.5)
    weight2 = jax.random.uniform(k2w, (d_out2, input_dim2), jnp.float32, -bound2, bound2)
    bias2 = jax.random.uniform(k2b, (d_out2,), jnp.float32, -bound2, bound2)
    x2 = jax.random.normal(k2x, (B2, input_dim2), jnp.float32)
    weight2_t = jnp.asarray(weight2.T)

    y2 = linear_multi_head_policy(x2, weight2_t, bias2, heads2, action_dim2,
                                  tiles=(64, 128, 128))
    y2 = jax.block_until_ready(y2)

    y2_ref = (x2 @ weight2.T + bias2).reshape(-1, heads2, action_dim2)
    assert y2.shape == (B2, heads2, action_dim2), y2.shape
    assert jnp.allclose(y2, y2_ref, atol=1e-4, rtol=1e-4), "mismatch vs reference (tiled)"

    print("KERNEL_OK")
</pallas_src>

<mosaic_0001>
module attributes {stable_mosaic.version = 11 : i64} {
  func.func @_linear_bias_kernel(%arg0: i32, %arg1: i32, %arg2: i32, %arg3: memref<8x128xf32, #tpu.memory_space<vmem>>, %arg4: memref<128x128xf32, #tpu.memory_space<vmem>>, %arg5: memref<1x128xf32, #tpu.memory_space<vmem>>, %arg6: memref<8x128xf32, #tpu.memory_space<vmem>>, %arg7: memref<8x128xf32, #tpu.memory_space<vmem>>) attributes {dimension_semantics = [#tpu.dimension_semantics<parallel>, #tpu.dimension_semantics<parallel>, #tpu.dimension_semantics<arbitrary>], iteration_bounds = array<i64: 1, 1, 1>, scalar_prefetch = 0 : i64, scratch_operands = 1 : i64, tpu.core_type = #tpu.core_type<tc>, window_params = [{transform_indices = @transform_0, window_bounds = array<i64: 8, 128>}, {transform_indices = @transform_1, window_bounds = array<i64: 128, 128>}, {transform_indices = @transform_2, window_bounds = array<i64: 1, 128>}, {transform_indices = @transform_3, window_bounds = array<i64: 8, 128>}]} {
    %c0_i32 = arith.constant 0 : i32
    %0 = arith.cmpi eq, %arg2, %c0_i32 : i32
    %1 = arith.extui %0 : i1 to i32
    %c0_i32_0 = arith.constant 0 : i32
    %2 = arith.cmpi ne, %1, %c0_i32_0 : i32
    scf.if %2 {
      %cst_10 = arith.constant 0.000000e+00 : f32
      %12 = vector.broadcast %cst_10 : f32 to vector<8x128xf32>
      %c0_11 = arith.constant 0 : index
      %c0_12 = arith.constant 0 : index
      %13 = vector.load %arg7[%c0_11, %c0_12] : memref<8x128xf32, #tpu.memory_space<vmem>>, vector<8x128xf32>
      tpu.vector_store %arg7[%c0_11, %c0_12], %12 {strides = array<i32>} : memref<8x128xf32, #tpu.memory_space<vmem>>, vector<8x128xf32>,
    } else {
    }
    %c0 = arith.constant 0 : index
    %c0_1 = arith.constant 0 : index
    %3 = vector.load %arg7[%c0, %c0_1] : memref<8x128xf32, #tpu.memory_space<vmem>>, vector<8x128xf32>
    %c0_2 = arith.constant 0 : index
    %c0_3 = arith.constant 0 : index
    %4 = vector.load %arg3[%c0_2, %c0_3] : memref<8x128xf32, #tpu.memory_space<vmem>>, vector<8x128xf32>
    %c0_4 = arith.constant 0 : index
    %c0_5 = arith.constant 0 : index
    %5 = vector.load %arg4[%c0_4, %c0_5] : memref<128x128xf32, #tpu.memory_space<vmem>>, vector<128x128xf32>
    %cst = arith.constant dense<0.000000e+00> : vector<8x128xf32>
    %6 = tpu.matmul %4, %5, %cst {dimension_numbers = #tpu.dot_dimension_numbers<[1], [0], [0], [1], [0, 0, 1, 1], [], []>} : vector<8x128xf32>, vector<128x128xf32>, vector<8x128xf32> -> vector<8x128xf32>
    %7 = arith.addf %3, %6 : vector<8x128xf32>
    %c0_6 = arith.constant 0 : index
    %c0_7 = arith.constant 0 : index
    %8 = vector.load %arg7[%c0_6, %c0_7] : memref<8x128xf32, #tpu.memory_space<vmem>>, vector<8x128xf32>
    tpu.vector_store %arg7[%c0_6, %c0_7], %7 {strides = array<i32>} : memref<8x128xf32, #tpu.memory_space<vmem>>, vector<8x128xf32>,
    %c0_i32_8 = arith.constant 0 : i32
    %9 = arith.cmpi eq, %arg2, %c0_i32_8 : i32
    %10 = arith.extui %9 : i1 to i32
    %c0_i32_9 = arith.constant 0 : i32
    %11 = arith.cmpi ne, %10, %c0_i32_9 : i32
    scf.if %11 {
      %c0_10 = arith.constant 0 : index
      %c0_11 = arith.constant 0 : index
      %12 = vector.load %arg7[%c0_10, %c0_11] : memref<8x128xf32, #tpu.memory_space<vmem>>, vector<8x128xf32>
      %c0_12 = arith.constant 0 : index
      %c0_13 = arith.constant 0 : index
      %13 = vector.load %arg5[%c0_12, %c0_13] : memref<1x128xf32, #tpu.memory_space<vmem>>, vector<1x128xf32>
      %14 = vector.broadcast %13 : vector<1x128xf32> to vector<8x128xf32>
      %15 = arith.addf %12, %14 : vector<8x128xf32>
      %c0_14 = arith.constant 0 : index
      %c0_15 = arith.constant 0 : index
      %16 = vector.load %arg6[%c0_14, %c0_15] : memref<8x128xf32, #tpu.memory_space<vmem>>, vector<8x128xf32>
      tpu.vector_store %arg6[%c0_14, %c0_15], %15 {strides = array<i32>} : memref<8x128xf32, #tpu.memory_space<vmem>>, vector<8x128xf32>,
    } else {
    }
    return
  }
  func.func @transform_0(%arg0: i32, %arg1: i32, %arg2: i32) -> (i32, i32) {
    %c0_i32 = arith.constant 0 : i32
    return %arg0, %arg2 : i32, i32
  }
  func.func @transform_1(%arg0: i32, %arg1: i32, %arg2: i32) -> (i32, i32) {
    %c0_i32 = arith.constant 0 : i32
    return %arg2, %arg1 : i32, i32
  }
  func.func @transform_2(%arg0: i32, %arg1: i32, %arg2: i32) -> (i32, i32) {
    %c0_i32 = arith.constant 0 : i32
    %c0_i32_0 = arith.constant 0 : i32
    return %c0_i32, %arg1 : i32, i32
  }
  func.func @transform_3(%arg0: i32, %arg1: i32, %arg2: i32) -> (i32, i32) {
    %c0_i32 = arith.constant 0 : i32
    return %arg0, %arg1 : i32, i32
  }
}

</mosaic_0001>

<bundles_post_ra>
// kernel: linear_multi_head_policy.1
= control target key start
LH: loop header
LB: loop body
LE: loop exit
PB: predicated region body
PF: predicated region fallthrough
CT: control target
= control target key end

     0   :  { %v181_v0 = vmov 0.0   ;;  %vm182_vm0 = vmmov 0   ;;  %s260_s1 = inlined_call_operand.vmem [shape: f32[128,128], index: 1, kind: input, shape index: {}]   ;;  %s261_s0 = inlined_call_operand.vmem [shape: f32[8,128], index: 0, kind: input, shape index: {}]   ;;  %s262_s2 = inlined_call_operand.vmem [shape: f32[1,128], index: 2, kind: input, shape index: {}]   ;;  %s263_s3 = inlined_call_operand.vmem [shape: f32[8,128], index: 3, kind: output, shape index: {}]  }
   0x1   :  { %144 = vmatprep.subr.mxu0 %v181_v0  ;;  %v36_v1 = vld [vmem:[%s260_s1 + $0x78] sm:$0xff]  ;;  %v35_v2 = vld [vmem:[%s260_s1 + $0x70] sm:$0xff]  ;;  %176 = vmatprep.mubr.msk.f32.mxu0 %vm182_vm0, %v181_v0  ;;  %v34_v3 = vld [vmem:[%s260_s1 + $0x68] sm:$0xff] }
   0x2   :  { %145 = vmatpush3.msra.mxu0 %v36_v1  ;;  %v33_v4 = vld [vmem:[%s260_s1 + $0x60] sm:$0xff]  ;;  %v32_v5 = vld [vmem:[%s260_s1 + $0x58] sm:$0xff]  ;;  %v31_v6 = vld [vmem:[%s260_s1 + $0x50] sm:$0xff] }
   0x3   :  { %146 = vmatprep.subr.mxu0 %v181_v0  ;;  %v30_v7 = vld [vmem:[%s260_s1 + $0x48] sm:$0xff]  ;;  %v29_v8 = vld [vmem:[%s260_s1 + $0x40] sm:$0xff]  ;;  %v28_v9 = vld [vmem:[%s260_s1 + $0x38] sm:$0xff] }
   0x4   :  { %147 = vmatpush3.msra.mxu0 %v35_v2  ;;  %v27_v10 = vld [vmem:[%s260_s1 + $0x30] sm:$0xff]  ;;  %v26_v11 = vld [vmem:[%s260_s1 + $0x28] sm:$0xff]  ;;  %v25_v12 = vld [vmem:[%s260_s1 + $0x20] sm:$0xff] }
   0x5   :  { %148 = vmatprep.subr.mxu0 %v181_v0  ;;  %v24_v13 = vld [vmem:[%s260_s1 + $0x18] sm:$0xff]  ;;  %v23_v14 = vld [vmem:[%s260_s1 + $0x10] sm:$0xff]  ;;  %v22_v15 = vld [vmem:[%s260_s1 + $0x8] sm:$0xff] }
   0x6   :  { %149 = vmatpush3.msra.mxu0 %v34_v3  ;;  %v21_v16 = vld [vmem:[%s260_s1] sm:$0xff] }
   0x7   :  { %150 = vmatprep.subr.mxu0 %v181_v0  ;;  %v20_v17 = vld [vmem:[%s261_s0] sm:$0xff] }
   0x8   :  { %151 = vmatpush3.msra.mxu0 %v33_v4  ;;  %v126_v18 = vld [vmem:[%s262_s2] ss:$0 sm:$0xff] }
   0x9   :  { %152 = vmatprep.subr.mxu0 %v181_v0 }
   0xa   :  { %153 = vmatpush3.msra.mxu0 %v32_v5 }
   0xb   :  { %154 = vmatprep.subr.mxu0 %v181_v0 }
   0xc   :  { %155 = vmatpush3.msra.mxu0 %v31_v6 }
   0xd   :  { %156 = vmatprep.subr.mxu0 %v181_v0 }
   0xe   :  { %157 = vmatpush3.msra.mxu0 %v30_v7 }
   0xf   :  { %158 = vmatprep.subr.mxu0 %v181_v0 }
  0x10   :  { %159 = vmatpush3.msra.mxu0 %v29_v8 }
  0x11   :  { %160 = vmatprep.subr.mxu0 %v181_v0 }
  0x12   :  { %161 = vmatpush3.msra.mxu0 %v28_v9 }
  0x13   :  { %162 = vmatprep.subr.mxu0 %v181_v0 }
  0x14   :  { %163 = vmatpush3.msra.mxu0 %v27_v10 }
  0x15   :  { %164 = vmatprep.subr.mxu0 %v181_v0 }
  0x16   :  { %165 = vmatpush3.msra.mxu0 %v26_v11 }
  0x17   :  { %166 = vmatprep.subr.mxu0 %v181_v0 }
  0x18   :  { %167 = vmatpush3.msra.mxu0 %v25_v12 }
  0x19   :  { %168 = vmatprep.subr.mxu0 %v181_v0 }
  0x1a   :  { %169 = vmatpush3.msra.mxu0 %v24_v13 }
  0x1b   :  { %170 = vmatprep.subr.mxu0 %v181_v0 }
  0x1c   :  { %171 = vmatpush3.msra.mxu0 %v23_v14 }
  0x1d   :  { %172 = vmatprep.subr.mxu0 %v181_v0 }
  0x1e   :  { %173 = vmatpush3.msra.mxu0 %v22_v15 }
  0x1f   :  { %174 = vmatprep.subr.mxu0 %v181_v0 }
  0x20   :  { %175 = vmatpush3.msra.mxu0 %v21_v16 }
  0x21   :  { %177 = vmatmul.mubr.f32.vlgmr.msra.gmra.mxu0 %v20_v17 }
  0xe1   :  { %v103_v19 = vpop.f32.mrf.mxu0 }
  0xe2   :  { %v120_v20 = vadd.f32 %v126_v18, %v103_v19 }
  0xe3   :  { %v178_v21 = vpop.f32.mrf.mxu0 }
  0xe4   :  { %121 = vst [vmem:[%s263_s3] sm:$0xff] %v120_v20 }

</bundles_post_ra>
